<compile_context>
chip_gen: v6e
topology: v6e:2x2x1
jax: 0.10.0
libtpu: 0.0.40
codegen_flags: <defaults>
</compile_context>

<pallas_src>
import jax
import jax.numpy as jnp
from jax.experimental import pallas as pl
from jax.experimental.pallas import tpu as pltpu


# ---------------------------------------------------------------------------
# Kernels: pure elementwise broadcast ops on one (TR, T) tile.
# ---------------------------------------------------------------------------
def _affine_kernel(scale_ref, shift_ref, x_ref, o_ref):
    # scale/shift: (TR, 1) f32 = (1 + gamma), beta;  x/o: (TR, T)
    o_ref[...] = (x_ref[...] * scale_ref[...] + shift_ref[...]).astype(o_ref.dtype)


def _shift_kernel(shift_ref, x_ref, o_ref):
    # shift: (TR, 1) f32 = Linear output;  x/o: (TR, T)
    o_ref[...] = (x_ref[...] + shift_ref[...]).astype(o_ref.dtype)


# ---------------------------------------------------------------------------
# Tiling helpers
# ---------------------------------------------------------------------------
def _round_up(v, m):
    return ((v + m - 1) // m) * m


def _tpu_generation():
    try:
        kind = jax.devices()[0].device_kind.lower()
    except Exception:
        return None
    for tag, gen in (("v7", 7), ("v6", 6), ("v5", 5), ("v4", 4)):
        if tag in kind:
            return gen
    return None


def _choose_tiles(bc, hw, itemsize, target_bytes):
    """Pick (row_tile TR, lane_tile T) for a (bc, hw) elementwise stream.

    T is always a multiple of 128 (the last spatial block may be ragged; OOB
    writes are dropped, which is safe for this pure elementwise op).  TR is a
    multiple of the dtype sublane packing, or the full bc when bc is tiny.
    One tile stays <= target_bytes so 2x-in + 2x-out double buffers fit the
    scoped-VMEM defaults on v5e/v6e/v7x."""
    sub = max(8, 32 // max(1, itemsize))          # f32->8, bf16->16, int8->32
    hw_pad = _round_up(hw, 128)

    # Lane tile: as large as the budget allows assuming a minimal row tile.
    t = min(hw_pad, max(128, (target_bytes // (sub * itemsize)) // 128 * 128))
    # Row tile: fill the remaining budget.
    if bc < sub:
        tr = bc                                   # full-dim block (layout rule OK)
    else:
        tr = min(_round_up(bc, sub),
                 max(sub, (target_bytes // (t * itemsize)) // sub * sub))

    # Guarantee >= 2 grid steps when possible so ("parallel","parallel") can
    # actually shard across both TensorCores on megacore parts (v7x).
    if pl.cdiv(bc, tr) * pl.cdiv(hw, t) < 2:
        if hw > 128:
            t = max(128, ((hw - 1) // 128) * 128)
        elif bc > sub:
            tr = max(sub, _round_up(pl.cdiv(bc, 2), sub))
    return tr, t


# ---------------------------------------------------------------------------
# Wrapper
# ---------------------------------------------------------------------------
def feature_wise_affine(x, noise_embed, weight, bias, *,
                        use_affine_level=False, donate_x=False):
    """x: (B, C, H, W) NCHW; noise_embed: (B, IN); weight: (OUT, IN); bias: (OUT,)."""
    B, C, H, W = x.shape
    OUT = weight.shape[0]
    assert OUT == C * (2 if use_affine_level else 1)
    HW = H * W
    BC = B * C

    # Tiny Linear hoisted out of the kernel: one full-batch XLA matmul in f32.
    lin = (noise_embed.astype(jnp.float32) @ weight.astype(jnp.float32).T
           + bias.astype(jnp.float32))            # (B, OUT)

    # 2D (B*C, H*W) view: rows are sublane-dense for any C, lanes carry the
    # long spatial axis.
    x_flat = x.reshape(BC, HW)

    gen = _tpu_generation()
    target_bytes = (4 if gen == 7 else 2) * 1024 * 1024
    TR, T = _choose_tiles(BC, HW, x.dtype.itemsize, target_bytes)
    grid = (pl.cdiv(BC, TR), pl.cdiv(HW, T))      # spatial axis innermost

    x_spec = pl.BlockSpec((TR, T), lambda i, j: (i, j))
    vec_spec = pl.BlockSpec((TR, 1), lambda i, j: (i, 0))   # no re-DMA across j

    compiler_params = pltpu.CompilerParams(
        dimension_semantics=("parallel", "parallel"),
        vmem_limit_bytes=32 * 1024 * 1024,
    )
    out_shape = jax.ShapeDtypeStruct((BC, HW), x.dtype)

    if use_affine_level:
        # Precompute (1 + gamma) and beta; keep them f32 (tiny) so low-precision
        # x does not see an extra rounding vs. the f32-Linear reference.
        scale = (1.0 + lin[:, :C]).reshape(BC, 1)
        shift = lin[:, C:].reshape(BC, 1)
        inputs = (scale, shift, x_flat)
        kernel = _affine_kernel
        x_idx = 2
    else:
        shift = lin.reshape(BC, 1)
        inputs = (shift, x_flat)
        kernel = _shift_kernel
        x_idx = 1

    out_flat = pl.pallas_call(
        kernel,
        out_shape=out_shape,
        grid=grid,
        in_specs=[vec_spec] * (len(inputs) - 1) + [x_spec],
        out_specs=x_spec,
        compiler_params=compiler_params,
        input_output_aliases=({x_idx: 0} if donate_x else {}),
    )(*inputs)

    # TODO(synk): inside a full UNet this broadcast-FMA is best left to XLA to
    # fuse into the neighbouring elementwise/norm op; a standalone pallas_call
    # is a fusion barrier and pays one extra HBM round trip of x.
    return out_flat.reshape(B, C, H, W)


# ---------------------------------------------------------------------------
# Pure-JAX reference (mirrors the PyTorch module)
# ---------------------------------------------------------------------------
def _reference(x, noise_embed, weight, bias, *, use_affine_level):
    B, C, H, W = x.shape
    lin = noise_embed @ weight.T + bias  # (B, OUT)
    if use_affine_level:
        gamma = lin[:, :C].reshape(B, C, 1, 1)
        beta = lin[:, C:].reshape(B, C, 1, 1)
        return (1.0 + gamma) * x + beta
    return x + lin.reshape(B, C, 1, 1)


if __name__ == "__main__":
    key = jax.random.PRNGKey(0)
    B, C, H, W = 2, 4, 16, 16
    IN_CH = 32  # noise embedding dim (in_channels of the Linear)

    k_x, k_e, k_w1, k_b1, k_w2, k_b2 = jax.random.split(key, 6)
    x = jax.random.normal(k_x, (B, C, H, W), dtype=jnp.float32)
    noise_embed = jax.random.normal(k_e, (B, IN_CH), dtype=jnp.float32)

    bound = 1.0 / jnp.sqrt(IN_CH)

    # --- use_affine_level = False : Linear(IN_CH -> C) ---
    w0 = jax.random.uniform(k_w1, (C, IN_CH), jnp.float32, -bound, bound)
    b0 = jax.random.uniform(k_b1, (C,), jnp.float32, -bound, bound)
    out0 = feature_wise_affine(x, noise_embed, w0, b0, use_affine_level=False)
    out0 = jax.block_until_ready(out0)
    ref0 = _reference(x, noise_embed, w0, b0, use_affine_level=False)

    # --- use_affine_level = True : Linear(IN_CH -> 2*C) ---
    w1 = jax.random.uniform(k_w2, (2 * C, IN_CH), jnp.float32, -bound, bound)
    b1 = jax.random.uniform(k_b2, (2 * C,), jnp.float32, -bound, bound)
    out1 = feature_wise_affine(x, noise_embed, w1, b1, use_affine_level=True)
    out1 = jax.block_until_ready(out1)
    ref1 = _reference(x, noise_embed, w1, b1, use_affine_level=True)

    assert out0.shape == (B, C, H, W) and out1.shape == (B, C, H, W)
    assert jnp.allclose(out0, ref0, atol=1e-5, rtol=1e-5)
    assert jnp.allclose(out1, ref1, atol=1e-5, rtol=1e-5)
    print("KERNEL_OK")
</pallas_src>

<mosaic_0001>
module attributes {stable_mosaic.version = 11 : i64} {
  func.func @_shift_kernel(%arg0: i32, %arg1: i32, %arg2: memref<8x1xf32, #tpu.memory_space<vmem>>, %arg3: memref<8x128xf32, #tpu.memory_space<vmem>>, %arg4: memref<8x128xf32, #tpu.memory_space<vmem>>) attributes {dimension_semantics = [#tpu.dimension_semantics<parallel>, #tpu.dimension_semantics<parallel>], iteration_bounds = array<i64: 1, 2>, scalar_prefetch = 0 : i64, scratch_operands = 0 : i64, tpu.core_type = #tpu.core_type<tc>, window_params = [{transform_indices = @transform_0, window_bounds = array<i64: 8, 1>}, {transform_indices = @transform_1, window_bounds = array<i64: 8, 128>}, {transform_indices = @transform_2, window_bounds = array<i64: 8, 128>}]} {
    %c0 = arith.constant 0 : index
    %c0_0 = arith.constant 0 : index
    %0 = vector.load %arg3[%c0, %c0_0] : memref<8x128xf32, #tpu.memory_space<vmem>>, vector<8x128xf32>
    %c0_1 = arith.constant 0 : index
    %c0_2 = arith.constant 0 : index
    %1 = vector.load %arg2[%c0_1, %c0_2] : memref<8x1xf32, #tpu.memory_space<vmem>>, vector<8x1xf32>
    %2 = vector.broadcast %1 : vector<8x1xf32> to vector<8x128xf32>
    %3 = arith.addf %0, %2 : vector<8x128xf32>
    %c0_3 = arith.constant 0 : index
    %c0_4 = arith.constant 0 : index
    %4 = vector.load %arg4[%c0_3, %c0_4] : memref<8x128xf32, #tpu.memory_space<vmem>>, vector<8x128xf32>
    tpu.vector_store %arg4[%c0_3, %c0_4], %3 {strides = array<i32>} : memref<8x128xf32, #tpu.memory_space<vmem>>, vector<8x128xf32>,
    return
  }
  func.func @transform_0(%arg0: i32, %arg1: i32) -> (i32, i32) {
    %c0_i32 = arith.constant 0 : i32
    %c0_i32_0 = arith.constant 0 : i32
    return %arg0, %c0_i32 : i32, i32
  }
  func.func @transform_1(%arg0: i32, %arg1: i32) -> (i32, i32) {
    %c0_i32 = arith.constant 0 : i32
    return %arg0, %arg1 : i32, i32
  }
  func.func @transform_2(%arg0: i32, %arg1: i32) -> (i32, i32) {
    %c0_i32 = arith.constant 0 : i32
    return %arg0, %arg1 : i32, i32
  }
}

</mosaic_0001>

<bundles_post_ra>
// kernel: tpu_custom_call.1
= control target key start
LH: loop header
LB: loop body
LE: loop exit
PB: predicated region body
PF: predicated region fallthrough
CT: control target
= control target key end

     0   :  { %7 = vsyncpa [#allocation3], 0  ;;  %s659_s0 = inlined_call_operand.vmem [shape: f32[8,1], index: 0, kind: input, shape index: {}]   ;;  %s660_s1 = inlined_call_operand.hbm [shape: f32[8,256], index: 1, kind: input, shape index: {}]   ;;  %s661_s2 = inlined_call_operand.hbm [shape: f32[8,256], index: 2, kind: output, shape index: {}]  }
   0x1   :  { %9 = vsyncpa [#allocation3 + $0x1], 0 }
   0x2   :  { %10 = vsyncpa [#allocation4], 0 }
   0x3   :  { %12 = vsyncpa [#allocation4 + $0x1], 0  ;;  %s522_s9 = smov 0   ;;  %s524_s10 = smov 0  }
   0x4   :  { %s526_s11 = smov 0   ;;  %s528_s12 = smov 0  }
   0x5   :  { %s530_s13 = smov 0   ;;  %s532_s14 = smov 0  }
   0x6 LB: > { %s316_s15 = sadd.s32 4294967295, %s502_s14   ;;  %s317_s16 = sadd.s32 4294967294, %s502_s14   ;;  %s502_s14 = sphi %s532_s14, %s18_s14   ;;  %s498_s13 = sphi %s530_s13, %s673_s13   ;;  %s494_s12 = sphi %s528_s12, %s672_s12   ;;  %s490_s11 = sphi %s526_s11, %s671_s11   ;;  %s486_s10 = sphi %s524_s10, %s670_s10   ;;  %s482_s9 = sphi %s522_s9, %s669_s9  }
   0x7   : > { %s27_s17 = sadd.s32 1, %s498_s13  ;;  %s65_s18 = sadd.s32 1, %s490_s11 }
   0x8   : > { %p28_p0 = scmp.ge.s32.totalorder %s27_s17, 2  ;;  %p72_p1 = scmp.ne.s32.totalorder %s490_s11, %s486_s10 }
   0x9   : > { %p73_p2 = scmp.eq.s32.totalorder %s502_s14, 0  ;;  %p78_p3 = scmp.ne.s32.totalorder %s486_s10, %s482_s9 }
   0xa   : > { %s675_s17 = smov (%p28_p0, %s27_s17), 0  ;;  %p79_p5 = scmp.eq.s32.totalorder %s316_s15, 0 }
   0xb   : > { %p563_p4 = por %p73_p2, %p72_p1  ;;  %s61_s20 = ssub.s32 %s498_s13, %s675_s17 }
   0xc   : > { %p104_p6 = scmp.eq.s32.totalorder %s316_s15, 1  ;;  %p63_p7 = scmp.eq.s32.totalorder %s61_s20, 0 }
   0xd   : > { %p569_p8 = por %p79_p5, %p78_p3  ;;  %p110_p10 = scmp.eq.s32.totalorder %s317_s16, 1 }
   0xe   : > { %p573_p9 = por %p104_p6, %p72_p1  ;;  %p342_p13 = scmp.lt.s32.totalorder %s502_s14, 2 }
   0xf   : > { %s578_s23 = scalar_select %p63_p7, %s490_s11, %s65_s18  }
  0x10   : > { %p580_p11 = por %p110_p10, %p78_p3  ;;  %s137_s25 = sand.u32 1, %s490_s11  }
  0x11   : > { %s321_s26 = sshll.u32 %s137_s25, 3  ;;  %s322_s27 = sshll.u32 %s498_s13, 7 }
  0x12   : > { %s665_s24 = scalar_select %p580_p11, 1, 0 }
  0x13   : > { %s148_s30 = scalar_lea.hbm %s660_s1, %s322_s27  ;;  %s141_s3 = scalar_lea.vmem [#allocation2], %s321_s26 }
  0x14   : > { %s150_s4 = sshll.u32 %s141_s3, 4  ;;  %p593_p0 = pnand %p342_p13, %p563_p4  ;;  %s151_s4 = int_to_ptr.vmem [resolvable:$true] %s150_s4 }
  0x15   : > { %p323_p1 = scmp.ge.s32.totalorder %s502_s14, 1  ;;  %p155_p2 = scmp.lt.s32.totalorder %s502_s14, 3 }
  0x16   : > { %s138_s6 = scalar_lea.sflag [#allocation3], %s137_s25  ;;  %p396_p3 = pneg %p593_p0 }
  0x17   : > { %s407_s7 = scalar_lea.vmem %s151_s4, 128  ;;  %s504_s8 = smov [#allocation2]  }
  0x18   : > { %p408_p5 = scmp.ne.s32.totalorder %s151_s4, %s407_s7  ;;  %s412_s15 = sshll.u32 %s504_s8, 4  ;;  %s413_s15 = int_to_ptr.vmem [resolvable:$false] %s412_s15 }
  0x19   : > { %s414_s16 = scalar_lea.vmem %s413_s15, 256  ;;  %p415_p10 = scmp.lt.s32.totalorder %s151_s4, %s413_s15 }
  0x1a   : > { %p410_p6 = pnand %p408_p5, %p396_p3  ;;  %p416_p12 = scmp.lt.s32.totalorder %s414_s16, %s407_s7 }
  0x1c   : > { %p411_p7 = pneg %p410_p6  ;;  %p417_p4 = por %p416_p12, %p415_p10 }
  0x1e   : > { %p418_p13 = pnand %p417_p4, %p411_p7 }
  0x20   : > { %421 = shalt.err (!%p418_p13)
}
  0x21   : > { %337 = dma.hbm_to_vmem [thread:$0]  (!%p593_p0), %s148_s30, 128, %s151_s4, %s138_s6  }
  0x22   : > { %p156_p11 = pnand %p323_p1, %p155_p2 }
  0x23   : > { %s608_s18 = sand.u32 (!%p156_p11), 1, %s486_s10  }
  0x24   : > { %159 = sbr.rel (%p156_p11) target bundleno = 183 (0xb7), region = 28  ;;  %s324_s19 = sshll.u32 (!%p156_p11), %s608_s18, 3 }
  0x25   : > { %s162_s20 = scalar_lea.sflag (!%p156_p11), [#allocation3], %s608_s18  ;;  %s165_s25 = scalar_lea.vmem (!%p156_p11), [#allocation2], %s324_s19 }
  0x29   : > { %473 = dma.done.wait (%p569_p8), %s162_s20, 128  }
  0x2a   : > { %475 = vsyncadd (%p569_p8), %s162_s20, 4294967168  ;;  %v505_v0 = vmov 0   ;;  %v195_v1 = vld [vmem:[%s659_s0] sm:$0xff]  ;;  %s327_s28 = sshll.u32 %s494_s12, 7  ;;  %s189_s29 = scalar_lea.vmem [#allocation5], %s324_s19 }
  0x2b   : > { %393 = vset.pattern.permute.xlu0 %v505_v0  ;;  %v194_v2 = vld [vmem:[%s165_s25] sm:$0xff]  ;;  %s219_s30 = sshll.u32 %s189_s29, 4  ;;  %s217_s21 = scalar_lea.hbm %s661_s2, %s327_s28  ;;  %s220_s30 = int_to_ptr.vmem [resolvable:$true] %s219_s30 }
  0x2c   : > { %198 = vperm.xlu0 %393, %v195_v1   ;;  %s204_s5 = scalar_lea.sflag [#allocation4], %s608_s18  ;;  %s422_s6 = scalar_lea.vmem %s220_s30, 128 }
  0x2d   : > { %p423_p8 = scmp.ne.s32.totalorder %s220_s30, %s422_s6  ;;  %s506_s7 = smov [#allocation5]  }
  0x2e   : > { %s426_s8 = sshll.u32 %s506_s7, 4  ;;  %s427_s8 = int_to_ptr.vmem [resolvable:$false] %s426_s8 }
  0x2f   : > { %p424_p11 = pnand %p423_p8, %p573_p9  ;;  %s428_s12 = scalar_lea.vmem %s427_s8, 256 }
  0x30   : > { %p429_p0 = scmp.lt.s32.totalorder %s220_s30, %s427_s8  ;;  %p430_p1 = scmp.lt.s32.totalorder %s428_s12, %s422_s6 }
  0x31   : > { %p425_p12 = pneg %p424_p11 }
  0x32   : > { %p431_p2 = por %p430_p1, %p429_p0 }
  0x34   : > { %p432_p3 = pnand %p431_p2, %p425_p12 }
  0xa7   : > { %v199_v3 = vpop.permute.xlu0 %198 }
  0xa8   : > { %v201_v4 = vadd.f32 %v199_v3, %v194_v2 }
  0xaa   : > { %202 = vst [vmem:[%s189_s29] sm:$0xff] %v201_v4 }
  0xab   : > { %435 = shalt.err (!%p432_p3)
}
  0xac   : > { %s436_s15 = scalar_lea.hbm %s217_s21, 128  ;;  %s440_s19 = scalar_lea.hbm %s661_s2, 256 }
  0xad   : > { %p437_p5 = scmp.ne.s32.totalorder %s217_s21, %s436_s15  ;;  %p441_p10 = scmp.lt.s32.totalorder %s217_s21, %s661_s2 }
  0xae   : > { %p442_p4 = scmp.lt.s32.totalorder %s440_s19, %s436_s15 }
  0xaf   : > { %p438_p6 = pnand %p437_p5, %p573_p9 }
  0xb0   : > { %p443_p13 = por %p442_p4, %p441_p10 }
  0xb1   : > { %p439_p7 = pneg %p438_p6 }
  0xb3   : > { %p444_p8 = pnand %p443_p13, %p439_p7 }
  0xb5   : > { %447 = shalt.err (!%p444_p8)
}
  0xb6   : > { %332 = dma.vmem_to_hbm [thread:$0]  (%p573_p9), %s220_s30, 128, %s217_s21, %s204_s5  }
  0xb7 PF: > { %s231_s26 = sand.u32 1, %s482_s9   ;;  %p667_p11 = scmp.ne.s32.totalorder %s665_s24, 0 }
  0xb8   : > { %p668_p12 = scmp.ge.s32.totalorder %s502_s14, 2  ;;  %s232_s27 = scalar_lea.sflag [#allocation4], %s231_s26 }
  0xba   : > { %p339_p0 = pnand %p668_p12, %p667_p11 }
  0xbc   : > { %p340_p1 = pneg %p339_p0 }
  0xbe   : > { %477 = dma.done.wait (%p340_p1), %s232_s27, 128  }
  0xbf   : > { %479 = vsyncadd (%p340_p1), %s232_s27, 4294967168  ;;  %s18_s14 = sadd.s32 1, %s502_s14   ;;  %s669_s9 = smov %s486_s10 }
  0xc0   : > { %p15_p2 = scmp.ge.s32.totalorder %s18_s14, 4   ;;  %s670_s10 = smov %s490_s11 }
  0xc1   : > { %s671_s11 = smov %s578_s23  ;;  %s672_s12 = smov %s498_s13 }
  0xc2   : > { %s673_s13 = smov %s675_s17  ;;  %17 = sbr.rel (!%p15_p2) target bundleno = 6 (0x6), region = 76 }
  0xc7   :  { %237 = vsyncpa [#allocation3], 1 }
  0xc8   :  { %239 = vsyncpa [#allocation3 + $0x1], 1 }
  0xc9   :  { %240 = vsyncpa [#allocation4], 1 }
  0xca   :  { %242 = vsyncpa [#allocation4 + $0x1], 1 }

</bundles_post_ra>
